<compile_context>
chip_gen: v7x
topology: tpu7x:2x2x1
jax: 0.10.0
libtpu: 0.0.40
codegen_flags: <defaults>
</compile_context>

<pallas_src>
import jax
import jax.numpy as jnp
from jax.experimental import pallas as pl
from jax.experimental.pallas import tpu as pltpu

_MIB = 1024 * 1024


def _round_up(v, m):
    return ((v + m - 1) // m) * m


def _tpu_vmem_bytes():
    try:
        info = pltpu.get_tpu_info()
        cap = getattr(info, "vmem_capacity_bytes", None)
        if cap:
            return int(cap)
    except Exception:
        pass
    return 64 * _MIB  # conservative (v7x-sized) fallback


# ---------------------------------------------------------------------------
# Kernels
# ---------------------------------------------------------------------------
def _fused_pool_linear_kernel(x_ref, w_ref, b_ref, o_ref):
    # x_ref: [TN, C*HW] (lane-dense), w_ref: [C*HW, Kp] (1/(H*W) folded in),
    # b_ref: [1, Kp] f32, o_ref: [TN, Kp].
    # Average pool + linear fused into one MXU contraction (f32 accumulation).
    out = jnp.dot(x_ref[...], w_ref[...], preferred_element_type=jnp.float32)
    o_ref[...] = (out + b_ref[...]).astype(o_ref.dtype)


def _pool_then_linear_kernel(x_ref, w_ref, b_ref, o_ref):
    # x_ref: [TN, C, HW], w_ref: [C, Kp] (1/(H*W) folded in), b_ref: [1, Kp].
    # Spatial sum with f32 accumulation (HW >= 128 so the lane reduce is dense).
    pooled = jnp.sum(x_ref[...], axis=-1, dtype=jnp.float32)          # [TN, C]
    out = jnp.dot(pooled.astype(w_ref.dtype), w_ref[...],
                  preferred_element_type=jnp.float32)                 # [TN, Kp]
    o_ref[...] = (out + b_ref[...]).astype(o_ref.dtype)


# ---------------------------------------------------------------------------
# Wrapper
# ---------------------------------------------------------------------------
def fast_rcnn_predictor(x_nchw, weight, bias, *, batch_tile=None):
    """FastRCNNPredictor forward: AdaptiveAvgPool2d(1) + Linear.

    x_nchw: [N, C, H, W]; weight: [K, C] (PyTorch Linear layout); bias: [K].
    batch_tile: optional cap on the batch tile size (tuning / testing knob).
    Returns poses: [N, K].
    """
    N, C, H, W = x_nchw.shape
    K = weight.shape[0]
    HW = H * W
    dtype = x_nchw.dtype
    itemsize = jnp.dtype(dtype).itemsize
    sub = (8 * 4) // itemsize              # sublane packing: 8 f32, 16 bf16
    K_pad = _round_up(K, 128)              # lane-dense output / sane MXU N-dim

    # ---- generation-aware VMEM / tile budgets --------------------------------
    vmem_phys = _tpu_vmem_bytes()
    if vmem_phys >= 96 * _MIB:             # v5e / v6e: 128 MiB VMEM, 1 TC
        vmem_cap = 80 * _MIB
        x_tile_budget = 24 * _MIB
        two_cores = False
    else:                                  # v7x-class: 64 MiB VMEM, 2 TCs
        vmem_cap = 44 * _MIB
        x_tile_budget = 10 * _MIB
        two_cores = True

    # ---- reduction strategy ---------------------------------------------------
    # Fuse the pool into the MXU when HW is small (<128 lanes) and the expanded
    # weight comfortably fits VMEM even if it ends up double-buffered
    # (important under v7x's 64 MiB; f32 C*HW*Kp weights fall back to 2-step).
    w_fused_bytes = _round_up(C * HW, sub) * K_pad * itemsize
    use_fused = (HW < 128) and (2 * w_fused_bytes + 8 * _MIB <= vmem_cap)

    w_scaled = (weight.T / float(HW)).astype(dtype)                   # [C, K]
    if use_fused:
        # W2[c*HW + hw, k] = w[k, c] / HW  matches x.reshape(N, C*HW).
        w_arg = jnp.pad(jnp.repeat(w_scaled, HW, axis=0),
                        ((0, 0), (0, K_pad - K)))                     # [C*HW, Kp]
        w_resident = w_fused_bytes
        x_arg = x_nchw.reshape(N, C * HW)
        padded_row_bytes = _round_up(C * HW, 128) * itemsize
    else:
        w_arg = jnp.pad(w_scaled, ((0, 0), (0, K_pad - K)))           # [C, Kp]
        w_resident = _round_up(C, sub) * K_pad * itemsize
        x_arg = x_nchw.reshape(N, C, HW)
        padded_row_bytes = _round_up(C, sub) * _round_up(HW, 128) * itemsize

    b_arg = jnp.pad(bias.astype(jnp.float32).reshape(1, K),
                    ((0, 0), (0, K_pad - K)))                         # [1, Kp] f32

    # ---- batch tile size (tn): biggest tile that fits the budget -------------
    # Budget assumes worst-case double-buffered weight so the vmem_limit is
    # never exceeded even if single-buffering is unavailable.
    avail_for_x = max(_MIB, (vmem_cap - 2 * w_resident - 4 * _MIB) // 2)
    budget = min(x_tile_budget, avail_for_x)
    tn = max(sub, budget // max(padded_row_bytes, 1))
    if batch_tile is not None:
        tn = min(tn, max(sub, int(batch_tile)))
    if tn >= 128:
        tn = min(1024, (tn // 128) * 128)      # fill MXU rows, big DMA steps
    else:
        tn = max(sub, (tn // sub) * sub)
    if tn >= N:
        tn = N                                  # single full block (no padding)
    grid_n = -(-N // tn)

    # v7x: keep the "parallel" N grid even so neither TensorCore idles.
    if two_cores and grid_n > 1 and grid_n % 2 == 1:
        tn_cand = max(sub, _round_up(-(-N // (grid_n + 1)), sub))
        g_cand = -(-N // tn_cand)
        if g_cand % 2 == 0:
            tn, grid_n = tn_cand, g_cand

    # ---- (8,128)-padded VMEM footprint + explicit limit with headroom --------
    if use_fused:
        x_tile_bytes = _round_up(tn, sub) * _round_up(C * HW, 128) * itemsize
    else:
        x_tile_bytes = tn * _round_up(C, sub) * _round_up(HW, 128) * itemsize
    out_tile_bytes = _round_up(tn, sub) * K_pad * itemsize
    b_bytes = 8 * K_pad * 4
    vmem_usage = (2 * x_tile_bytes + 2 * out_tile_bytes
                  + 2 * w_resident + 2 * b_bytes)        # conservative 2x bufs
    vmem_limit = int(min(vmem_cap, max(16 * _MIB, 2 * vmem_usage)))

    n_eff = grid_n * tn
    if use_fused:
        flops = 2 * n_eff * C * HW * K_pad
    else:
        flops = n_eff * C * HW + 2 * n_eff * C * K_pad
    cost = pl.CostEstimate(
        flops=int(flops),
        transcendentals=0,
        bytes_accessed=int(n_eff * C * HW * itemsize      # x read (dominant)
                           + w_arg.size * itemsize
                           + b_arg.size * 4
                           + n_eff * K_pad * itemsize),
    )

    def _call(single_buffer_resident):
        def _resident_spec(shape, imap):
            # Weight / bias never change across the grid: single-buffer them.
            if single_buffer_resident and hasattr(pl, "Buffered"):
                return pl.BlockSpec(shape, imap, pipeline_mode=pl.Buffered(1))
            return pl.BlockSpec(shape, imap)

        if use_fused:
            kernel = _fused_pool_linear_kernel
            x_spec = pl.BlockSpec((tn, C * HW), lambda i: (i, 0))
            w_spec = _resident_spec((C * HW, K_pad), lambda i: (0, 0))
        else:
            kernel = _pool_then_linear_kernel
            x_spec = pl.BlockSpec((tn, C, HW), lambda i: (i, 0, 0))
            w_spec = _resident_spec((C, K_pad), lambda i: (0, 0))
        b_spec = _resident_spec((1, K_pad), lambda i: (0, 0))

        return pl.pallas_call(
            kernel,
            out_shape=jax.ShapeDtypeStruct((N, K_pad), dtype),
            grid_spec=pltpu.PrefetchScalarGridSpec(
                num_scalar_prefetch=0,
                grid=(grid_n,),
                in_specs=[x_spec, w_spec, b_spec],
                out_specs=pl.BlockSpec((tn, K_pad), lambda i: (i, 0)),
            ),
            compiler_params=pltpu.CompilerParams(
                dimension_semantics=("parallel",),
                vmem_limit_bytes=vmem_limit,
            ),
            cost_estimate=cost,
        )(x_arg, w_arg, b_arg)

    try:
        out = _call(True)
    except Exception:
        # jax without BlockSpec pipeline_mode / Buffered(1): fall back to the
        # default double-buffered (still small) resident weight and bias.
        out = _call(False)

    # Slice away the num_classes lane padding (no N padding to remove).
    return out[:, :K]


if __name__ == "__main__":
    key = jax.random.PRNGKey(0)
    k1, k2, k3, k4, k5 = jax.random.split(key, 5)

    # ---- Test 1: module-sized toy shapes (HW = 256 >= 128 -> pool-then-matmul)
    N, C, H, W = 2, 4, 16, 16
    NUM_CLASSES = 8
    x = jax.random.normal(k1, (N, C, H, W), dtype=jnp.float32)
    # nn.init.normal_(weight, mean=0, std=0.01); bias = 0 (module init)
    weight = 0.01 * jax.random.normal(k2, (NUM_CLASSES, C), dtype=jnp.float32)
    bias = jnp.zeros((NUM_CLASSES,), dtype=jnp.float32)

    poses = jax.block_until_ready(fast_rcnn_predictor(x, weight, bias))
    ref = jnp.mean(x, axis=(2, 3)) @ weight.T + bias
    assert poses.shape == (N, NUM_CLASSES)
    assert jnp.allclose(poses, ref, atol=1e-5, rtol=1e-5)

    # ---- Test 2: ROI-head-like 7x7 spatial (HW = 49 < 128 -> fused MXU pool)
    #      with a batch tile that does not divide N (ragged last grid block).
    N2, C2, H2, W2, K2 = 10, 16, 7, 7, 8
    x2 = jax.random.normal(k3, (N2, C2, H2, W2), dtype=jnp.float32)
    w2 = 0.01 * jax.random.normal(k4, (K2, C2), dtype=jnp.float32)
    b2 = 0.01 * jax.random.normal(k5, (K2,), dtype=jnp.float32)

    poses2 = jax.block_until_ready(
        fast_rcnn_predictor(x2, w2, b2, batch_tile=8))
    ref2 = jnp.mean(x2, axis=(2, 3)) @ w2.T + b2
    assert poses2.shape == (N2, K2)
    assert jnp.allclose(poses2, ref2, atol=1e-5, rtol=1e-5)

    print("KERNEL_OK")
</pallas_src>

<mosaic_0001>
module attributes {stable_mosaic.version = 11 : i64} {
  func.func @_pool_then_linear_kernel(%arg0: i32, %arg1: memref<2x4x256xf32, #tpu.memory_space<vmem>>, %arg2: memref<4x128xf32, #tpu.memory_space<vmem>>, %arg3: memref<1x128xf32, #tpu.memory_space<vmem>>, %arg4: memref<2x128xf32, #tpu.memory_space<vmem>>) attributes {dimension_semantics = [#tpu.dimension_semantics<parallel>], iteration_bounds = array<i64: 1>, scalar_prefetch = 0 : i64, scratch_operands = 0 : i64, tpu.core_type = #tpu.core_type<tc>, window_params = [{transform_indices = @transform_0, window_bounds = array<i64: 2, 4, 256>}, {pipeline_mode = #tpu.pipeline_mode<synchronous>, transform_indices = @transform_1, window_bounds = array<i64: 4, 128>}, {pipeline_mode = #tpu.pipeline_mode<synchronous>, transform_indices = @transform_2, window_bounds = array<i64: 1, 128>}, {transform_indices = @transform_3, window_bounds = array<i64: 2, 128>}]} {
    %c0 = arith.constant 0 : index
    %c0_0 = arith.constant 0 : index
    %c0_1 = arith.constant 0 : index
    %0 = vector.load %arg1[%c0, %c0_0, %c0_1] : memref<2x4x256xf32, #tpu.memory_space<vmem>>, vector<2x4x256xf32>
    %cst = arith.constant dense<0.000000e+00> : vector<2x4xf32>
    %1 = vector.multi_reduction <add>, %0, %cst [2] : vector<2x4x256xf32> to vector<2x4xf32>
    %c0_2 = arith.constant 0 : index
    %c0_3 = arith.constant 0 : index
    %2 = vector.load %arg2[%c0_2, %c0_3] : memref<4x128xf32, #tpu.memory_space<vmem>>, vector<4x128xf32>
    %cst_4 = arith.constant dense<0.000000e+00> : vector<2x128xf32>
    %3 = tpu.matmul %1, %2, %cst_4 {dimension_numbers = #tpu.dot_dimension_numbers<[1], [0], [0], [1], [0, 0, 1, 1], [], []>} : vector<2x4xf32>, vector<4x128xf32>, vector<2x128xf32> -> vector<2x128xf32>
    %c0_5 = arith.constant 0 : index
    %c0_6 = arith.constant 0 : index
    %4 = vector.load %arg3[%c0_5, %c0_6] : memref<1x128xf32, #tpu.memory_space<vmem>>, vector<1x128xf32>
    %5 = vector.broadcast %4 : vector<1x128xf32> to vector<2x128xf32>
    %6 = arith.addf %3, %5 : vector<2x128xf32>
    %c0_7 = arith.constant 0 : index
    %c0_8 = arith.constant 0 : index
    %7 = vector.load %arg4[%c0_7, %c0_8] : memref<2x128xf32, #tpu.memory_space<vmem>>, vector<2x128xf32>
    tpu.vector_store %arg4[%c0_7, %c0_8], %6 {strides = array<i32>} : memref<2x128xf32, #tpu.memory_space<vmem>>, vector<2x128xf32>,
    return
  }
  func.func @transform_0(%arg0: i32) -> (i32, i32, i32) {
    %c0_i32 = arith.constant 0 : i32
    %c0_i32_0 = arith.constant 0 : i32
    %c0_i32_1 = arith.constant 0 : i32
    return %arg0, %c0_i32, %c0_i32_0 : i32, i32, i32
  }
  func.func @transform_1(%arg0: i32) -> (i32, i32) {
    %c0_i32 = arith.constant 0 : i32
    %c0_i32_0 = arith.constant 0 : i32
    %c0_i32_1 = arith.constant 0 : i32
    return %c0_i32, %c0_i32_0 : i32, i32
  }
  func.func @transform_2(%arg0: i32) -> (i32, i32) {
    %c0_i32 = arith.constant 0 : i32
    %c0_i32_0 = arith.constant 0 : i32
    %c0_i32_1 = arith.constant 0 : i32
    return %c0_i32, %c0_i32_0 : i32, i32
  }
  func.func @transform_3(%arg0: i32) -> (i32, i32) {
    %c0_i32 = arith.constant 0 : i32
    %c0_i32_0 = arith.constant 0 : i32
    return %arg0, %c0_i32 : i32, i32
  }
}

module attributes {stable_mosaic.version = 11 : i64} {
  func.func @_pool_then_linear_kernel(%arg0: i32, %arg1: memref<2x4x256xf32, #tpu.memory_space<vmem>>, %arg2: memref<4x128xf32, #tpu.memory_space<vmem>>, %arg3: memref<1x128xf32, #tpu.memory_space<vmem>>, %arg4: memref<2x128xf32, #tpu.memory_space<vmem>>) attributes {dimension_semantics = [#tpu.dimension_semantics<parallel>], iteration_bounds = array<i64: 1>, scalar_prefetch = 0 : i64, scratch_operands = 0 : i64, tpu.core_type = #tpu.core_type<tc>, window_params = [{transform_indices = @transform_0, window_bounds = array<i64: 2, 4, 256>}, {pipeline_mode = #tpu.pipeline_mode<synchronous>, transform_indices = @transform_1, window_bounds = array<i64: 4, 128>}, {pipeline_mode = #tpu.pipeline_mode<synchronous>, transform_indices = @transform_2, window_bounds = array<i64: 1, 128>}, {transform_indices = @transform_3, window_bounds = array<i64: 2, 128>}]} {
    %c0 = arith.constant 0 : index
    %c0_0 = arith.constant 0 : index
    %c0_1 = arith.constant 0 : index
    %0 = vector.load %arg1[%c0, %c0_0, %c0_1] : memref<2x4x256xf32, #tpu.memory_space<vmem>>, vector<2x4x256xf32>
    %cst = arith.constant dense<0.000000e+00> : vector<2x4xf32>
    %1 = vector.multi_reduction <add>, %0, %cst [2] : vector<2x4x256xf32> to vector<2x4xf32>
    %c0_2 = arith.constant 0 : index
    %c0_3 = arith.constant 0 : index
    %2 = vector.load %arg2[%c0_2, %c0_3] : memref<4x128xf32, #tpu.memory_space<vmem>>, vector<4x128xf32>
    %cst_4 = arith.constant dense<0.000000e+00> : vector<2x128xf32>
    %3 = tpu.matmul %1, %2, %cst_4 {dimension_numbers = #tpu.dot_dimension_numbers<[1], [0], [0], [1], [0, 0, 1, 1], [], []>} : vector<2x4xf32>, vector<4x128xf32>, vector<2x128xf32> -> vector<2x128xf32>
    %c0_5 = arith.constant 0 : index
    %c0_6 = arith.constant 0 : index
    %4 = vector.load %arg3[%c0_5, %c0_6] : memref<1x128xf32, #tpu.memory_space<vmem>>, vector<1x128xf32>
    %5 = vector.broadcast %4 : vector<1x128xf32> to vector<2x128xf32>
    %6 = arith.addf %3, %5 : vector<2x128xf32>
    %c0_7 = arith.constant 0 : index
    %c0_8 = arith.constant 0 : index
    %7 = vector.load %arg4[%c0_7, %c0_8] : memref<2x128xf32, #tpu.memory_space<vmem>>, vector<2x128xf32>
    tpu.vector_store %arg4[%c0_7, %c0_8], %6 {strides = array<i32>} : memref<2x128xf32, #tpu.memory_space<vmem>>, vector<2x128xf32>,
    return
  }
  func.func @transform_0(%arg0: i32) -> (i32, i32, i32) {
    %c0_i32 = arith.constant 0 : i32
    %c0_i32_0 = arith.constant 0 : i32
    %c0_i32_1 = arith.constant 0 : i32
    return %arg0, %c0_i32, %c0_i32_0 : i32, i32, i32
  }
  func.func @transform_1(%arg0: i32) -> (i32, i32) {
    %c0_i32 = arith.constant 0 : i32
    %c0_i32_0 = arith.constant 0 : i32
    %c0_i32_1 = arith.constant 0 : i32
    return %c0_i32, %c0_i32_0 : i32, i32
  }
  func.func @transform_2(%arg0: i32) -> (i32, i32) {
    %c0_i32 = arith.constant 0 : i32
    %c0_i32_0 = arith.constant 0 : i32
    %c0_i32_1 = arith.constant 0 : i32
    return %c0_i32, %c0_i32_0 : i32, i32
  }
  func.func @transform_3(%arg0: i32) -> (i32, i32) {
    %c0_i32 = arith.constant 0 : i32
    %c0_i32_0 = arith.constant 0 : i32
    return %arg0, %c0_i32 : i32, i32
  }
}

</mosaic_0001>

<bundles_post_ra>
// kernel: tpu_custom_call.1
= control target key start
LH: loop header
LB: loop body
LE: loop exit
PB: predicated region body
PF: predicated region fallthrough
CT: control target
= control target key end

     0   :  { %8 = vsyncpa [#allocation3], 0  ;;  %s337_s0 = inlined_call_operand.hbm [shape: f32[2,4,256], index: 0, kind: input, shape index: {}]   ;;  %s338_s1 = inlined_call_operand.hbm [shape: f32[4,128], index: 1, kind: input, shape index: {}]   ;;  %s339_s2 = inlined_call_operand.vmem [shape: f32[1,128], index: 2, kind: input, shape index: {}]   ;;  %s340_s3 = inlined_call_operand.hbm [shape: f32[2,128], index: 3, kind: output, shape index: {}]  }
   0x1   :  { %9 = vsyncpa [#allocation6], 0 }
   0x2   :  { %10 = vsyncpa [#allocation4], 0  ;;  %s266_s12 = smov [#allocation2]   ;;  %s194_s16 = scalar_lea.hbm %s337_s0, 256 }
   0x3   :  { %s16_s13 = sshll.u32 %s266_s12, 4  ;;  %p195_p0 = scmp.ne.s32.totalorder %s337_s0, %s194_s16  ;;  %s17_s13 = int_to_ptr.vmem [resolvable:$true] %s16_s13 }
   0x4   :  { %p198_p1 = scmp.lt.u32.totalorder %s194_s16, %s337_s0 }
   0x6   :  { %p200_p2 = pnand %p198_p1, %p195_p0 }
   0x8   :  { %203 = shalt.err (!%p200_p2)
}
   0x9   :  { %s204_s21 = scalar_lea.vmem %s17_s13, 256  ;;  %p209_p4 = scmp.lt.s32.totalorder %s17_s13, %s17_s13 }
   0xa   :  { %p205_p3 = scmp.ne.s32.totalorder %s17_s13, %s204_s21  ;;  %p210_p5 = scmp.lt.s32.totalorder %s204_s21, %s204_s21 }
   0xc   :  { %p211_p6 = por %p210_p5, %p209_p4 }
   0xe   :  { %p212_p7 = pnand %p211_p6, %p205_p3 }
  0x10   :  { %215 = shalt.err (!%p212_p7)
}
  0x11   :  { %s267_s22 = smov 128   ;;  %s268_s23 = smov 8  }
  0x12   :  { %22 = dma.hbm_to_vmem [thread:$0]  %s337_s0, 256, %s17_s13, [#allocation3], %s267_s22, %s267_s22, %s268_s23  }
  0x13   :  { %s269_s26 = smov [#allocation5]   ;;  %s216_s30 = scalar_lea.hbm %s338_s1, 64 }
  0x14   :  { %s29_s27 = sshll.u32 %s269_s26, 4  ;;  %p217_p8 = scmp.ne.s32.totalorder %s338_s1, %s216_s30  ;;  %s30_s27 = int_to_ptr.vmem [resolvable:$true] %s29_s27 }
  0x15   :  { %p220_p9 = scmp.lt.u32.totalorder %s216_s30, %s338_s1 }
  0x17   :  { %p222_p10 = pnand %p220_p9, %p217_p8 }
  0x19   :  { %225 = shalt.err (!%p222_p10)
}
  0x1a   :  { %s226_s8 = scalar_lea.vmem %s30_s27, 64  ;;  %p231_p12 = scmp.lt.s32.totalorder %s30_s27, %s30_s27 }
  0x1b   :  { %p227_p11 = scmp.ne.s32.totalorder %s30_s27, %s226_s8  ;;  %p232_p13 = scmp.lt.s32.totalorder %s226_s8, %s226_s8 }
  0x1d   :  { %p233_p0 = por %p232_p13, %p231_p12 }
  0x1f   :  { %p234_p1 = pnand %p233_p0, %p227_p11 }
  0x21   :  { %237 = shalt.err (!%p234_p1)
}
  0x22   :  { %32 = dma.hbm_to_vmem [thread:$0]  %s338_s1, 64, %s30_s27, [#allocation6]  }
  0x23   :  { %260 = dma.done.wait [#allocation3], 256  }
  0x24   :  { %261 = vsyncadd [#allocation3], 4294967040 }
  0x25   :  { %262 = dma.done.wait [#allocation6], 64  }
  0x26   :  { %263 = vsyncadd [#allocation6], 4294967232  ;;  %vm49_vm0 = vcmask 1043456   ;;  %v41_v0 = vld [vmem:[#allocation2] sm:$0xff]  ;;  %v42_v1 = vld [vmem:[#allocation2 + $0x8] sm:$0xff]  ;;  %v270_v11 = vmov 0.0   ;;  %v70_v12 = vlaneseq }
  0x27   :  { %v45_v2 = vcombine.high %v41_v0, %v41_v0  ;;  %v50_v3 = vsel %vm49_vm0, %v41_v0, 0.0  ;;  %v46_v4 = vcombine.high %v42_v1, %v42_v1  ;;  %v55_v6 = vsel %vm49_vm0, %v42_v1, 0.0  ;;  %v60_v10 = vld [vmem:[#allocation5] sm:$0xf]  ;;  %180 = vmatprep.subr.mxu0 %v270_v11  ;;  %v175_v21 = vld [vmem:[%s339_s2] ss:$0 sm:$0xff] }
  0x28   :  { %vm271_vm1 = vmmov 0   ;;  %181 = vmatpush3.msk.msra.mxu0 %vm49_vm0, %v60_v10  ;;  %v71_v13 = vand.u32 127, %v70_v12  ;;  %v73_v14 = vshrl.u32 %v70_v12, 7  ;;  %vm80_vm2 = vcmask 1041409   ;;  %s272_s11 = smov [#allocation7]  }
  0x29   :  { %v51_v5 = vsel %vm49_vm0, %v45_v2, 0.0  ;;  %v56_v7 = vsel %vm49_vm0, %v46_v4, 0.0  ;;  %182 = vmatprep.mubr.msk.f32.mxu0 %vm271_vm1, %v270_v11  ;;  %vm82_vm3 = vcmask 31744   ;;  %s165_s12 = sshll.u32 %s272_s11, 4  ;;  %s166_s12 = int_to_ptr.vmem [resolvable:$true] %s165_s12 }
  0x2a   :  { %v52_v8 = vadd.f32 %v51_v5, %v50_v3  ;;  %v57_v9 = vadd.f32 %v56_v7, %v55_v6  ;;  %v74_v16 = vsub.s32 %v71_v13, %v73_v14  ;;  %s238_s13 = scalar_lea.vmem %s166_s12, 32  ;;  %p243_p3 = scmp.lt.s32.totalorder %s166_s12, %s166_s12 }
  0x2b   :  { %p239_p2 = scmp.ne.s32.totalorder %s166_s12, %s238_s13  ;;  %p244_p4 = scmp.lt.s32.totalorder %s238_s13, %s238_s13 }
  0x2c   :  { %53 = vadd.xlane.f32.xlu0 %v52_v8 }
  0x2d   :  { %p245_p5 = por %p244_p4, %p243_p3 }
  0x2f   :  { %p246_p6 = pnand %p245_p5, %p239_p2 }
  0x30   :  { %58 = vadd.xlane.f32.xlu0 %v57_v9 }
  0xb9   :  { %v54_v15 = vpop.xlane.xlu0 %53 }
  0xba   :  { %v75_v18 = vrot.slane %v54_v15, %v74_v16 }
  0xbd   :  { %v59_v17 = vpop.xlane.xlu0 %58 }
  0xbe   :  { %v79_v19 = vrot.slane %v59_v17, %v74_v16 }
  0xc0   :  { %v81_v20 = vsel %vm80_vm2, %v79_v19, %v75_v18 }
  0xc1   :  { %183 = vmatmul.mubr.msk.f32.vlgmr.msra.gmra.mrb[0].mxu0 %vm82_vm3, %v81_v20 }
 0x194   :  { %v154_v22 = vpop.f32.mrb[0].mxu0 }
 0x195   :  { %v155_v23 = vadd.f32 %v175_v21, %v154_v22  ;;  %v184_v24 = vpop.f32.mrb[1].mxu0 }
 0x197   :  { %158 = vst [vmem:[#allocation7] sm:$0x3] %v155_v23 }
 0x198   :  { %249 = shalt.err (!%p246_p6)
}
 0x199   :  { %s250_s16 = scalar_lea.hbm %s340_s3, 32 }
 0x19a   :  { %p251_p7 = scmp.ne.s32.totalorder %s340_s3, %s250_s16  ;;  %p254_p8 = scmp.lt.u32.totalorder %s250_s16, %s340_s3 }
 0x19c   :  { %p256_p9 = pnand %p254_p8, %p251_p7 }
 0x19e   :  { %259 = shalt.err (!%p256_p9)
}
 0x19f   :  { %168 = dma.vmem_to_hbm [thread:$0]  %s166_s12, 32, %s340_s3, [#allocation4]  }
 0x1a0   :  { %264 = dma.done.wait [#allocation4], 32  }
 0x1a1   :  { %265 = vsyncadd [#allocation4], 4294967264 }
 0x1a2   :  { %172 = vsyncpa [#allocation3], 1 }
 0x1a3   :  { %173 = vsyncpa [#allocation6], 1 }
 0x1a4   :  { %174 = vsyncpa [#allocation4], 1 }

// kernel: tpu_custom_call.1
= control target key start
LH: loop header
LB: loop body
LE: loop exit
PB: predicated region body
PF: predicated region fallthrough
CT: control target
= control target key end

     0   :  { %8 = vsyncpa [#allocation3], 0  ;;  %s337_s0 = inlined_call_operand.hbm [shape: f32[2,4,256], index: 0, kind: input, shape index: {}]   ;;  %s338_s1 = inlined_call_operand.hbm [shape: f32[4,128], index: 1, kind: input, shape index: {}]   ;;  %s339_s2 = inlined_call_operand.vmem [shape: f32[1,128], index: 2, kind: input, shape index: {}]   ;;  %s340_s3 = inlined_call_operand.hbm [shape: f32[2,128], index: 3, kind: output, shape index: {}]  }
   0x1   :  { %9 = vsyncpa [#allocation6], 0 }
   0x2   :  { %10 = vsyncpa [#allocation4], 0  ;;  %s266_s12 = smov [#allocation2]   ;;  %s194_s16 = scalar_lea.hbm %s337_s0, 256 }
   0x3   :  { %s16_s13 = sshll.u32 %s266_s12, 4  ;;  %p195_p0 = scmp.ne.s32.totalorder %s337_s0, %s194_s16  ;;  %s17_s13 = int_to_ptr.vmem [resolvable:$true] %s16_s13 }
   0x4   :  { %p198_p1 = scmp.lt.u32.totalorder %s194_s16, %s337_s0 }
   0x6   :  { %p200_p2 = pnand %p198_p1, %p195_p0 }
   0x8   :  { %203 = shalt.err (!%p200_p2)
}
   0x9   :  { %s204_s21 = scalar_lea.vmem %s17_s13, 256  ;;  %p209_p4 = scmp.lt.s32.totalorder %s17_s13, %s17_s13 }
   0xa   :  { %p205_p3 = scmp.ne.s32.totalorder %s17_s13, %s204_s21  ;;  %p210_p5 = scmp.lt.s32.totalorder %s204_s21, %s204_s21 }
   0xc   :  { %p211_p6 = por %p210_p5, %p209_p4 }
   0xe   :  { %p212_p7 = pnand %p211_p6, %p205_p3 }
  0x10   :  { %215 = shalt.err (!%p212_p7)
}
  0x11   :  { %s267_s22 = smov 128   ;;  %s268_s23 = smov 8  }
  0x12   :  { %22 = dma.hbm_to_vmem [thread:$0]  %s337_s0, 256, %s17_s13, [#allocation3], %s267_s22, %s267_s22, %s268_s23  }
  0x13   :  { %s269_s26 = smov [#allocation5]   ;;  %s216_s30 = scalar_lea.hbm %s338_s1, 64 }
  0x14   :  { %s29_s27 = sshll.u32 %s269_s26, 4  ;;  %p217_p8 = scmp.ne.s32.totalorder %s338_s1, %s216_s30  ;;  %s30_s27 = int_to_ptr.vmem [resolvable:$true] %s29_s27 }
  0x15   :  { %p220_p9 = scmp.lt.u32.totalorder %s216_s30, %s338_s1 }
  0x17   :  { %p222_p10 = pnand %p220_p9, %p217_p8 }
  0x19   :  { %225 = shalt.err (!%p222_p10)
}
  0x1a   :  { %s226_s8 = scalar_lea.vmem %s30_s27, 64  ;;  %p231_p12 = scmp.lt.s32.totalorder %s30_s27, %s30_s27 }
  0x1b   :  { %p227_p11 = scmp.ne.s32.totalorder %s30_s27, %s226_s8  ;;  %p232_p13 = scmp.lt.s32.totalorder %s226_s8, %s226_s8 }
  0x1d   :  { %p233_p0 = por %p232_p13, %p231_p12 }
  0x1f   :  { %p234_p1 = pnand %p233_p0, %p227_p11 }
  0x21   :  { %237 = shalt.err (!%p234_p1)
}
  0x22   :  { %32 = dma.hbm_to_vmem [thread:$0]  %s338_s1, 64, %s30_s27, [#allocation6]  }
  0x23   :  { %260 = dma.done.wait [#allocation3], 256  }
  0x24   :  { %261 = vsyncadd [#allocation3], 4294967040 }
  0x25   :  { %262 = dma.done.wait [#allocation6], 64  }
  0x26   :  { %263 = vsyncadd [#allocation6], 4294967232  ;;  %vm49_vm0 = vcmask 1043456   ;;  %v41_v0 = vld [vmem:[#allocation2] sm:$0xff]  ;;  %v42_v1 = vld [vmem:[#allocation2 + $0x8] sm:$0xff]  ;;  %v270_v11 = vmov 0.0   ;;  %v70_v12 = vlaneseq }
  0x27   :  { %v45_v2 = vcombine.high %v41_v0, %v41_v0  ;;  %v50_v3 = vsel %vm49_vm0, %v41_v0, 0.0  ;;  %v46_v4 = vcombine.high %v42_v1, %v42_v1  ;;  %v55_v6 = vsel %vm49_vm0, %v42_v1, 0.0  ;;  %v60_v10 = vld [vmem:[#allocation5] sm:$0xf]  ;;  %180 = vmatprep.subr.mxu0 %v270_v11  ;;  %v175_v21 = vld [vmem:[%s339_s2] ss:$0 sm:$0xff] }
  0x28   :  { %vm271_vm1 = vmmov 0   ;;  %181 = vmatpush3.msk.msra.mxu0 %vm49_vm0, %v60_v10  ;;  %v71_v13 = vand.u32 127, %v70_v12  ;;  %v73_v14 = vshrl.u32 %v70_v12, 7  ;;  %vm80_vm2 = vcmask 1041409   ;;  %s272_s11 = smov [#allocation7]  }
  0x29   :  { %v51_v5 = vsel %vm49_vm0, %v45_v2, 0.0  ;;  %v56_v7 = vsel %vm49_vm0, %v46_v4, 0.0  ;;  %182 = vmatprep.mubr.msk.f32.mxu0 %vm271_vm1, %v270_v11  ;;  %vm82_vm3 = vcmask 31744   ;;  %s165_s12 = sshll.u32 %s272_s11, 4  ;;  %s166_s12 = int_to_ptr.vmem [resolvable:$true] %s165_s12 }
  0x2a   :  { %v52_v8 = vadd.f32 %v51_v5, %v50_v3  ;;  %v57_v9 = vadd.f32 %v56_v7, %v55_v6  ;;  %v74_v16 = vsub.s32 %v71_v13, %v73_v14  ;;  %s238_s13 = scalar_lea.vmem %s166_s12, 32  ;;  %p243_p3 = scmp.lt.s32.totalorder %s166_s12, %s166_s12 }
  0x2b   :  { %p239_p2 = scmp.ne.s32.totalorder %s166_s12, %s238_s13  ;;  %p244_p4 = scmp.lt.s32.totalorder %s238_s13, %s238_s13 }
  0x2c   :  { %53 = vadd.xlane.f32.xlu0 %v52_v8 }
  0x2d   :  { %p245_p5 = por %p244_p4, %p243_p3 }
  0x2f   :  { %p246_p6 = pnand %p245_p5, %p239_p2 }
  0x30   :  { %58 = vadd.xlane.f32.xlu0 %v57_v9 }
  0xb9   :  { %v54_v15 = vpop.xlane.xlu0 %53 }
  0xba   :  { %v75_v18 = vrot.slane %v54_v15, %v74_v16 }
  0xbd   :  { %v59_v17 = vpop.xlane.xlu0 %58 }
  0xbe   :  { %v79_v19 = vrot.slane %v59_v17, %v74_v16 }
  0xc0   :  { %v81_v20 = vsel %vm80_vm2, %v79_v19, %v75_v18 }
  0xc1   :  { %183 = vmatmul.mubr.msk.f32.vlgmr.msra.gmra.mrb[0].mxu0 %vm82_vm3, %v81_v20 }
 0x194   :  { %v154_v22 = vpop.f32.mrb[0].mxu0 }
 0x195   :  { %v155_v23 = vadd.f32 %v175_v21, %v154_v22  ;;  %v184_v24 = vpop.f32.mrb[1].mxu0 }
 0x197   :  { %158 = vst [vmem:[#allocation7] sm:$0x3] %v155_v23 }
 0x198   :  { %249 = shalt.err (!%p246_p6)
}
 0x199   :  { %s250_s16 = scalar_lea.hbm %s340_s3, 32 }
 0x19a   :  { %p251_p7 = scmp.ne.s32.totalorder %s340_s3, %s250_s16  ;;  %p254_p8 = scmp.lt.u32.totalorder %s250_s16, %s340_s3 }
 0x19c   :  { %p256_p9 = pnand %p254_p8, %p251_p7 }
 0x19e   :  { %259 = shalt.err (!%p256_p9)
}
 0x19f   :  { %168 = dma.vmem_to_hbm [thread:$0]  %s166_s12, 32, %s340_s3, [#allocation4]  }
 0x1a0   :  { %264 = dma.done.wait [#allocation4], 32  }
 0x1a1   :  { %265 = vsyncadd [#allocation4], 4294967264 }
 0x1a2   :  { %172 = vsyncpa [#allocation3], 1 }
 0x1a3   :  { %173 = vsyncpa [#allocation6], 1 }
 0x1a4   :  { %174 = vsyncpa [#allocation4], 1 }

</bundles_post_ra>
